<compile_context>
chip_gen: v7x
topology: tpu7x:2x2x1
jax: 0.10.0
libtpu: 0.0.40
codegen_flags: <defaults>
</compile_context>

<pallas_src>
import jax
import jax.numpy as jnp
from jax.experimental import pallas as pl
from jax.experimental.pallas import tpu as pltpu


def paa_kernel(xf_ref, qb_ref, mask_ref, uw_ref, t_ref, out_ref):
    tb, s, k = xf_ref.shape          # TB batch rows, seq len, I+F
    a = uw_ref.shape[-1]             # attn_size
    isz = out_ref.shape[-1]          # input_size

    xf = xf_ref[...]                                                   # (TB, S, I+F)

    # Fused projection on the MXU: [x|f] @ [U;W], f32 accumulation; M = TB*S.
    proj = jnp.dot(xf.reshape(tb * s, k), uw_ref[...],
                   preferred_element_type=jnp.float32)                 # (TB*S, A)
    proj = proj.reshape(tb, s, a) + qb_ref[...][:, None, :]            # + (q@V + b_u)

    h = jnp.tanh(proj)                                                 # (TB, S, A)

    # Attention logits t . h : VPU multiply + lane reduction (MXU stays free).
    scores = jnp.sum(h * t_ref[...].astype(jnp.float32), axis=-1)      # (TB, S)
    # (tlinear bias omitted: uniform shift cancels in the softmax below.)
    scores = jnp.where(mask_ref[...] != 0, -jnp.inf, scores)

    # Softmax over the sequence (lane) axis; masked lanes -> exp(-inf) = 0.
    # NOTE: a fully-masked row yields NaN, matching the PyTorch/JAX reference.
    m = jnp.max(scores, axis=-1, keepdims=True)                        # (TB, 1)
    e = jnp.exp(scores - m)                                            # (TB, S)
    w = e * pl.reciprocal(jnp.sum(e, axis=-1, keepdims=True), approx=True)

    # Weighted sum over the sequence: (TB,S,1)*(TB,S,I) -> sublane reduce -> (TB,I).
    x = xf[:, :, :isz].astype(jnp.float32)
    out_ref[...] = jnp.sum(w[:, :, None] * x, axis=1).astype(out_ref.dtype)


def _round_up(x, m):
    return ((x + m - 1) // m) * m


def position_aware_attention(x, x_mask, q, f, params, *, tb=None, compute_dtype=None):
    """x: (B,S,I) f32, x_mask: (B,S) nonzero = masked, q: (B,Q), f: (B,S,F) -> (B, I)."""
    B, S, I = x.shape
    Fdim = f.shape[-1]
    A = params["uw"].shape[-1]
    K = I + Fdim
    out_dtype = x.dtype

    # ---- host-side (XLA) prep: hoist batch-constant / fuseable pieces ----------
    # q-projection + ulinear bias: constant over the sequence -> one batched GEMM.
    qb = q.astype(jnp.float32) @ params["vw"].astype(jnp.float32) + params["ub"]     # (B, A)
    # Fused input slab [x | f] and stacked weight [U ; W]: one K=(I+F) contraction.
    xf = jnp.concatenate([x, f], axis=-1)                                            # (B, S, K)
    uw = jnp.concatenate([params["uw"], params["ww"]], axis=0)                       # (K, A)
    tvec = params["tw"].reshape(1, A).astype(jnp.float32)                            # (1, A)
    mask = x_mask.astype(jnp.int32).reshape(B, S)

    if compute_dtype is not None:            # e.g. jnp.bfloat16 on v6e / v7x MXUs
        xf = xf.astype(compute_dtype)
        uw = uw.astype(compute_dtype)

    # ---- batch blocking: TB rows per grid step (matmul M dim = TB*S) ------------
    if tb is None:
        tb = max(8, -(-256 // S))            # target M = TB*S around 256 (>=128 for v5e)
        tb = min(_round_up(tb, 8), _round_up(B, 8))
        # TODO(synk): at production shapes, cap TB against the v7x 64 MiB VMEM budget
        # (double-buffered (TB,S,I+F) slabs) and raise vmem_limit_bytes if needed.
    Bp = _round_up(B, tb)
    if Bp != B:
        pad = Bp - B
        xf = jnp.pad(xf, ((0, pad), (0, 0), (0, 0)))
        qb = jnp.pad(qb, ((0, pad), (0, 0)))
        mask = jnp.pad(mask, ((0, pad), (0, 0)))   # padded rows unmasked -> finite softmax

    grid = (Bp // tb,)

    out = pl.pallas_call(
        paa_kernel,
        out_shape=jax.ShapeDtypeStruct((Bp, I), out_dtype),
        grid_spec=pltpu.PrefetchScalarGridSpec(
            num_scalar_prefetch=0,
            grid=grid,
            in_specs=[
                pl.BlockSpec((tb, S, K), lambda b: (b, 0, 0)),   # [x | f] slab
                pl.BlockSpec((tb, A),    lambda b: (b, 0)),      # q@V + b_u
                pl.BlockSpec((tb, S),    lambda b: (b, 0)),      # mask
                pl.BlockSpec((K, A),     lambda b: (0, 0)),      # [U ; W] (resident)
                pl.BlockSpec((1, A),     lambda b: (0, 0)),      # t       (resident)
            ],
            out_specs=pl.BlockSpec((tb, I), lambda b: (b, 0)),   # lane-dense (TB, I) store
        ),
        compiler_params=pltpu.CompilerParams(
            dimension_semantics=("parallel",),
        ),
    )(xf, qb, mask, uw, tvec)

    return out[:B]


def reference(x, x_mask, q, f, params):
    """Pure-JAX reference mirroring the PyTorch forward (includes b_t)."""
    x_proj = x @ params["uw"] + params["ub"]                    # (B,S,A)
    q_proj = (q @ params["vw"])[:, None, :]                     # (B,1,A)
    f_proj = f @ params["ww"]                                   # (B,S,A)
    h = jnp.tanh(x_proj + q_proj + f_proj)
    scores = (h @ params["tw"])[..., 0] + params["tb"][0, 0]    # (B,S)
    scores = jnp.where(x_mask != 0, -jnp.inf, scores)
    w = jax.nn.softmax(scores, axis=1)                          # (B,S)
    return jnp.einsum("bs,bsi->bi", w, x)


if __name__ == "__main__":
    # Sizes implied by the module: input_size I, query_size Q, feature_size F, attn_size A.
    B, S, I, Q, F, A = 10, 8, 32, 48, 16, 64

    key = jax.random.PRNGKey(0)
    k = jax.random.split(key, 10)

    # Synthetic parameters (nn.Linear shapes, stored pre-transposed).
    params = {
        "uw": 0.001 * jax.random.normal(k[0], (I, A), jnp.float32),  # ulinear.weight^T
        "ub": 0.05 * jax.random.normal(k[1], (1, A), jnp.float32),   # ulinear.bias
        "vw": 0.001 * jax.random.normal(k[2], (Q, A), jnp.float32),  # vlinear.weight^T (no bias)
        "ww": 0.001 * jax.random.normal(k[3], (F, A), jnp.float32),  # wlinear.weight^T (no bias)
        "tw": 0.01 * jax.random.normal(k[4], (A, 1), jnp.float32),   # tlinear.weight^T
        "tb": 0.01 * jax.random.normal(k[5], (1, 1), jnp.float32),   # tlinear.bias
    }

    x = jax.random.normal(k[6], (B, S, I), jnp.float32)
    q = jax.random.normal(k[7], (B, Q), jnp.float32)
    f = jax.random.normal(k[8], (B, S, F), jnp.float32)

    # Padding-style mask: position >= length is masked (nonzero == masked).
    lengths = (3 + (jax.random.randint(k[9], (B,), 0, S - 3))).astype(jnp.int32)
    x_mask = (jnp.arange(S)[None, :] >= lengths[:, None]).astype(jnp.int32)   # (B, S)

    ref = reference(x, x_mask, q, f, params)

    # Default TB (pads B=10 -> 16, single grid step).
    out = jax.block_until_ready(position_aware_attention(x, x_mask, q, f, params))
    assert out.shape == (B, I)
    # Only deviation from the exact f32 reference is the EUP approximate reciprocal
    # in the softmax normalization (and b_t, which cancels exactly).
    assert jnp.max(jnp.abs(out - ref)) < 2e-3, jnp.max(jnp.abs(out - ref))

    # Explicit TB=8 (pads B=10 -> 16, two grid steps) to exercise the block index map.
    out8 = jax.block_until_ready(position_aware_attention(x, x_mask, q, f, params, tb=8))
    assert out8.shape == (B, I)
    assert jnp.max(jnp.abs(out8 - ref)) < 2e-3, jnp.max(jnp.abs(out8 - ref))

    print("KERNEL_OK")
</pallas_src>

<mosaic_0001>
module attributes {stable_mosaic.version = 11 : i64} {
  func.func @paa_kernel(%arg0: i32, %arg1: memref<16x8x48xf32, #tpu.memory_space<vmem>>, %arg2: memref<16x64xf32, #tpu.memory_space<vmem>>, %arg3: memref<16x8xi32, #tpu.memory_space<vmem>>, %arg4: memref<48x64xf32, #tpu.memory_space<vmem>>, %arg5: memref<1x64xf32, #tpu.memory_space<vmem>>, %arg6: memref<16x32xf32, #tpu.memory_space<vmem>>) attributes {dimension_semantics = [#tpu.dimension_semantics<parallel>], iteration_bounds = array<i64: 1>, scalar_prefetch = 0 : i64, scratch_operands = 0 : i64, tpu.core_type = #tpu.core_type<tc>, window_params = [{transform_indices = @transform_0, window_bounds = array<i64: 16, 8, 48>}, {transform_indices = @transform_1, window_bounds = array<i64: 16, 64>}, {transform_indices = @transform_2, window_bounds = array<i64: 16, 8>}, {pipeline_mode = #tpu.pipeline_mode<synchronous>, transform_indices = @transform_3, window_bounds = array<i64: 48, 64>}, {pipeline_mode = #tpu.pipeline_mode<synchronous>, transform_indices = @transform_4, window_bounds = array<i64: 1, 64>}, {transform_indices = @transform_5, window_bounds = array<i64: 16, 32>}]} {
    %c0 = arith.constant 0 : index
    %c0_0 = arith.constant 0 : index
    %c0_1 = arith.constant 0 : index
    %0 = vector.load %arg1[%c0, %c0_0, %c0_1] : memref<16x8x48xf32, #tpu.memory_space<vmem>>, vector<16x8x48xf32>
    %1 = vector.shape_cast %0 : vector<16x8x48xf32> to vector<128x48xf32>
    %c0_2 = arith.constant 0 : index
    %c0_3 = arith.constant 0 : index
    %2 = vector.load %arg4[%c0_2, %c0_3] : memref<48x64xf32, #tpu.memory_space<vmem>>, vector<48x64xf32>
    %cst = arith.constant dense<0.000000e+00> : vector<128x64xf32>
    %3 = tpu.matmul %1, %2, %cst {dimension_numbers = #tpu.dot_dimension_numbers<[1], [0], [0], [1], [0, 0, 1, 1], [], []>} : vector<128x48xf32>, vector<48x64xf32>, vector<128x64xf32> -> vector<128x64xf32>
    %4 = vector.shape_cast %3 : vector<128x64xf32> to vector<16x8x64xf32>
    %c0_4 = arith.constant 0 : index
    %c0_5 = arith.constant 0 : index
    %5 = vector.load %arg2[%c0_4, %c0_5] : memref<16x64xf32, #tpu.memory_space<vmem>>, vector<16x64xf32>
    %6 = vector.shape_cast %5 : vector<16x64xf32> to vector<16x1x64xf32>
    %7 = vector.broadcast %6 : vector<16x1x64xf32> to vector<16x8x64xf32>
    %8 = arith.addf %4, %7 : vector<16x8x64xf32>
    %9 = math.tanh %8 : vector<16x8x64xf32>
    %c0_6 = arith.constant 0 : index
    %c0_7 = arith.constant 0 : index
    %10 = vector.load %arg5[%c0_6, %c0_7] : memref<1x64xf32, #tpu.memory_space<vmem>>, vector<1x64xf32>
    %11 = vector.shape_cast %10 : vector<1x64xf32> to vector<1x1x64xf32>
    %12 = vector.broadcast %11 : vector<1x1x64xf32> to vector<16x8x64xf32>
    %13 = arith.mulf %9, %12 : vector<16x8x64xf32>
    %cst_8 = arith.constant dense<0.000000e+00> : vector<16x8xf32>
    %14 = vector.multi_reduction <add>, %13, %cst_8 [2] : vector<16x8x64xf32> to vector<16x8xf32>
    %c0_9 = arith.constant 0 : index
    %c0_10 = arith.constant 0 : index
    %15 = vector.load %arg3[%c0_9, %c0_10] : memref<16x8xi32, #tpu.memory_space<vmem>>, vector<16x8xi32>
    %c0_i32 = arith.constant 0 : i32
    %16 = vector.broadcast %c0_i32 : i32 to vector<16x8xi32>
    %17 = arith.cmpi ne, %15, %16 : vector<16x8xi32>
    %cst_11 = arith.constant 0xFF800000 : f32
    %18 = vector.broadcast %cst_11 : f32 to vector<16x8xf32>
    %19 = arith.select %17, %18, %14 : vector<16x8xi1>, vector<16x8xf32>
    %cst_12 = arith.constant dense<0xFF800000> : vector<16xf32>
    %20 = vector.multi_reduction <maximumf>, %19, %cst_12 [1] : vector<16x8xf32> to vector<16xf32>
    %21 = vector.shape_cast %20 : vector<16xf32> to vector<16x1xf32>
    %22 = vector.broadcast %21 : vector<16x1xf32> to vector<16x8xf32>
    %23 = arith.subf %19, %22 : vector<16x8xf32>
    %24 = math.exp %23 : vector<16x8xf32>
    %cst_13 = arith.constant dense<0.000000e+00> : vector<16xf32>
    %25 = vector.multi_reduction <add>, %24, %cst_13 [1] : vector<16x8xf32> to vector<16xf32>
    %26 = vector.shape_cast %25 : vector<16xf32> to vector<16x1xf32>
    %27 = tpu.reciprocal %26 {approx = true} : vector<16x1xf32> -> vector<16x1xf32>
    %28 = vector.broadcast %27 : vector<16x1xf32> to vector<16x8xf32>
    %29 = arith.mulf %24, %28 : vector<16x8xf32>
    %30 = vector.extract_strided_slice %0 {offsets = [0, 0, 0], sizes = [16, 8, 32], strides = [1, 1, 1]} : vector<16x8x48xf32> to vector<16x8x32xf32>
    %31 = vector.shape_cast %29 : vector<16x8xf32> to vector<16x8x1xf32>
    %32 = vector.broadcast %31 : vector<16x8x1xf32> to vector<16x8x32xf32>
    %33 = arith.mulf %32, %30 : vector<16x8x32xf32>
    %cst_14 = arith.constant dense<0.000000e+00> : vector<16x32xf32>
    %34 = vector.multi_reduction <add>, %33, %cst_14 [1] : vector<16x8x32xf32> to vector<16x32xf32>
    %c0_15 = arith.constant 0 : index
    %c0_16 = arith.constant 0 : index
    %35 = vector.load %arg6[%c0_15, %c0_16] : memref<16x32xf32, #tpu.memory_space<vmem>>, vector<16x32xf32>
    tpu.vector_store %arg6[%c0_15, %c0_16], %34 {strides = array<i32>} : memref<16x32xf32, #tpu.memory_space<vmem>>, vector<16x32xf32>,
    return
  }
  func.func @transform_0(%arg0: i32) -> (i32, i32, i32) {
    %c0_i32 = arith.constant 0 : i32
    %c0_i32_0 = arith.constant 0 : i32
    %c0_i32_1 = arith.constant 0 : i32
    return %arg0, %c0_i32, %c0_i32_0 : i32, i32, i32
  }
  func.func @transform_1(%arg0: i32) -> (i32, i32) {
    %c0_i32 = arith.constant 0 : i32
    %c0_i32_0 = arith.constant 0 : i32
    return %arg0, %c0_i32 : i32, i32
  }
  func.func @transform_2(%arg0: i32) -> (i32, i32) {
    %c0_i32 = arith.constant 0 : i32
    %c0_i32_0 = arith.constant 0 : i32
    return %arg0, %c0_i32 : i32, i32
  }
  func.func @transform_3(%arg0: i32) -> (i32, i32) {
    %c0_i32 = arith.constant 0 : i32
    %c0_i32_0 = arith.constant 0 : i32
    %c0_i32_1 = arith.constant 0 : i32
    return %c0_i32, %c0_i32_0 : i32, i32
  }
  func.func @transform_4(%arg0: i32) -> (i32, i32) {
    %c0_i32 = arith.constant 0 : i32
    %c0_i32_0 = arith.constant 0 : i32
    %c0_i32_1 = arith.constant 0 : i32
    return %c0_i32, %c0_i32_0 : i32, i32
  }
  func.func @transform_5(%arg0: i32) -> (i32, i32) {
    %c0_i32 = arith.constant 0 : i32
    %c0_i32_0 = arith.constant 0 : i32
    return %arg0, %c0_i32 : i32, i32
  }
}

</mosaic_0001>

<bundles_post_ra>
// kernel: tpu_custom_call.1
= control target key start
LH: loop header
LB: loop body
LE: loop exit
PB: predicated region body
PF: predicated region fallthrough
CT: control target
= control target key end

     0   :  { %10 = vsyncpa [#allocation3], 0  ;;  %s1494_s0 = inlined_call_operand.hbm [shape: f32[16,8,48], index: 0, kind: input, shape index: {}]   ;;  %s1495_s1 = inlined_call_operand.vmem [shape: f32[16,64], index: 1, kind: input, shape index: {}]   ;;  %s1496_s2 = inlined_call_operand.vmem [shape: s32[16,8], index: 2, kind: input, shape index: {}]   ;;  %s1497_s3 = inlined_call_operand.hbm [shape: f32[48,64], index: 3, kind: input, shape index: {}]   ;;  %s1498_s4 = inlined_call_operand.vmem [shape: f32[1,64], index: 4, kind: input, shape index: {}]   ;;  %s1499_s5 = inlined_call_operand.hbm [shape: f32[16,32], index: 5, kind: output, shape index: {}]  }
   0x1   :  { %11 = vsyncpa [#allocation6], 0 }
   0x2   :  { %12 = vsyncpa [#allocation4], 0  ;;  %s1191_s18 = smov [#allocation2]   ;;  %s1119_s22 = scalar_lea.hbm %s1494_s0, 2048 }
   0x3   :  { %s18_s19 = sshll.u32 %s1191_s18, 4  ;;  %p1120_p0 = scmp.ne.s32.totalorder %s1494_s0, %s1119_s22  ;;  %s19_s19 = int_to_ptr.vmem [resolvable:$true] %s18_s19 }
   0x4   :  { %p1123_p1 = scmp.lt.u32.totalorder %s1119_s22, %s1494_s0 }
   0x6   :  { %p1125_p2 = pnand %p1123_p1, %p1120_p0 }
   0x8   :  { %1128 = shalt.err (!%p1125_p2)
}
   0x9   :  { %s1129_s27 = scalar_lea.vmem %s19_s19, 2048  ;;  %p1134_p4 = scmp.lt.s32.totalorder %s19_s19, %s19_s19 }
   0xa   :  { %p1130_p3 = scmp.ne.s32.totalorder %s19_s19, %s1129_s27  ;;  %p1135_p5 = scmp.lt.s32.totalorder %s1129_s27, %s1129_s27 }
   0xc   :  { %p1136_p6 = por %p1135_p5, %p1134_p4 }
   0xe   :  { %p1137_p7 = pnand %p1136_p6, %p1130_p3 }
  0x10   :  { %1140 = shalt.err (!%p1137_p7)
}
  0x11   :  { %s1192_s28 = smov 128   ;;  %s1193_s29 = smov 8  }
  0x12   :  { %24 = dma.hbm_to_vmem [thread:$0]  %s1494_s0, 2048, %s19_s19, [#allocation3], %s1192_s28, %s1192_s28, %s1193_s29  }
  0x13   :  { %s1194_s7 = smov [#allocation5]   ;;  %s1141_s11 = scalar_lea.hbm %s1497_s3, 768 }
  0x14   :  { %s34_s8 = sshll.u32 %s1194_s7, 4  ;;  %p1142_p8 = scmp.ne.s32.totalorder %s1497_s3, %s1141_s11  ;;  %s35_s8 = int_to_ptr.vmem [resolvable:$true] %s34_s8 }
  0x15   :  { %p1145_p9 = scmp.lt.u32.totalorder %s1141_s11, %s1497_s3 }
  0x17   :  { %p1147_p10 = pnand %p1145_p9, %p1142_p8 }
  0x19   :  { %1150 = shalt.err (!%p1147_p10)
}
  0x1a   :  { %s1151_s16 = scalar_lea.vmem %s35_s8, 768  ;;  %p1156_p12 = scmp.lt.s32.totalorder %s35_s8, %s35_s8 }
  0x1b   :  { %p1152_p11 = scmp.ne.s32.totalorder %s35_s8, %s1151_s16  ;;  %p1157_p13 = scmp.lt.s32.totalorder %s1151_s16, %s1151_s16 }
  0x1d   :  { %p1158_p0 = por %p1157_p13, %p1156_p12 }
  0x1f   :  { %p1159_p1 = pnand %p1158_p0, %p1152_p11 }
  0x21   :  { %1162 = shalt.err (!%p1159_p1)
}
  0x22   :  { %40 = dma.hbm_to_vmem [thread:$0]  %s1497_s3, 768, %s35_s8, [#allocation6], %s1192_s28, %s1192_s28, %s1193_s29  }
  0x23   :  { %1185 = dma.done.wait [#allocation3], 2048  }
  0x24   :  { %1186 = vsyncadd [#allocation3], 4294965248 }
  0x25   :  { %1187 = dma.done.wait [#allocation6], 768  }
  0x26   :  { %1188 = vsyncadd [#allocation6], 4294966528  ;;  %v65_v0 = vld [vmem:[#allocation5] sm:$0xff]  ;;  %v66_v1 = vld [vmem:[#allocation5 + $0x8] sm:$0xff]  ;;  %vm71_vm0 = vcmask 392192   ;;  %v273_v27 = vlaneseq  ;;  %vm502_vm1 = vcmask 523264  }
  0x27   :  { %v67_v2 = vld [vmem:[#allocation5 + $0x10] sm:$0xff]  ;;  %v1053_v3 = vpack.c.bf16 %v66_v1, %v65_v0  ;;  %v68_v4 = vld [vmem:[#allocation5 + $0x18] sm:$0xff]  ;;  %v69_v6 = vld [vmem:[#allocation5 + $0x20] sm:$0xff]  ;;  %v1195_v25 = vmov 1966171168   ;;  %vm637_vm2 = vcmask 1041409  }
  0x28   :  { %v1057_v5 = vpack.c.bf16 %v68_v4, %v67_v2  ;;  %v70_v7 = vld [vmem:[#allocation5 + $0x28] sm:$0xff]  ;;  %v1257_v8 = vld [vmem:[#allocation2] sm:$0xff]  ;;  %v1269_v13 = vld [vmem:[#allocation2 + $0x10] sm:$0xff]  ;;  %v271_v26 = vunpack.c.l.s4 %v1195_v25  ;;  %v1322_v29 = vshrl.u32 %v273_v27, 7  ;;  %vm639_vm3 = vcmask 1042434  }
  0x29   :  { %1054 = vmatprep.subr.bf16.mxu0 %v1053_v3  ;;  %1065 = vmatprep.subr.bf16.mxu1 %v1053_v3  ;;  %v1259_v9 = vld [vmem:[#allocation2 + $0x40] sm:$0xff]  ;;  %v1061_v10 = vpack.c.bf16 %v70_v7, %v69_v6  ;;  %v1265_v11 = vld [vmem:[#allocation2 + $0x8] sm:$0xff]  ;;  %v1271_v14 = vld [vmem:[#allocation2 + $0x50] sm:$0xff]  ;;  %vm641_vm4 = vcmask 1043459   ;;  %vm643_vm5 = vcmask 1044484   ;;  %vm645_vm6 = vcmask 1045509  }
  0x2a   :  { %1056 = vmatpush3.bf16.msra.mxu0 %v1053_v3  ;;  %1068 = vmatpush3.bf16.msra.mxu1 %v1053_v3  ;;  %v1267_v12 = vld [vmem:[#allocation2 + $0x48] sm:$0xff]  ;;  %v1279_v15 = vld [vmem:[#allocation2 + $0x18] sm:$0xff]  ;;  %v1285_v17 = vld [vmem:[#allocation2 + $0x20] sm:$0xff]  ;;  %v272_v28 = vunpack.c.0.s8 %v271_v26  ;;  %v1332_v40 = vsub.s32 0, %v1322_v29  ;;  %vm647_vm7 = vcmask 1046534   ;;  %vm649_vm8 = vcmask 1047559  }
  0x2b   :  { %1058 = vmatprep.subr.bf16.mxu0 %v1057_v5  ;;  %1066 = vmatprep.subr.bf16.mxu1 %v1057_v5  ;;  %v1283_v16 = vld [vmem:[#allocation2 + $0x58] sm:$0xff]  ;;  %v1287_v18 = vld [vmem:[#allocation2 + $0x60] sm:$0xff]  ;;  %v1295_v19 = vld [vmem:[#allocation2 + $0x28] sm:$0xff]  ;;  %vm662_vm11 = vcmask 64512   ;;  %vm813_vm12 = vcmask 261120  }
  0x2c   :  { %1029 = vmatprep.mubr.msk.f32.mxu0 %vm71_vm0, %v1257_v8  ;;  %1041 = vmatprep.mubr.msk.f32.mxu1 %vm71_vm0, %v1259_v9  ;;  %v1299_v20 = vld [vmem:[#allocation2 + $0x68] sm:$0xff]  ;;  %v1301_v21 = vld [vmem:[#allocation2 + $0x30] sm:$0xff]  ;;  %v1311_v23 = vld [vmem:[#allocation2 + $0x38] sm:$0xff]  ;;  %v275_v30 = vsub.s32 %v272_v28, %v1322_v29 }
  0x2d   :  { %v1303_v22 = vld [vmem:[#allocation2 + $0x70] sm:$0xff]  ;;  %v1315_v24 = vld [vmem:[#allocation2 + $0x78] sm:$0xff]  ;;  %v265_v31 = vld [vmem:[%s1495_s1] sm:$0xff] }
  0x2e   :  { %1060 = vmatpush3.bf16.msra.mxu0 %v1057_v5  ;;  %1069 = vmatpush3.bf16.msra.mxu1 %v1057_v5  ;;  %v266_v32 = vld [vmem:[%s1495_s1 + $0x8] sm:$0xff]  ;;  %v276_v33 = vrot.slane %v265_v31, %v275_v30  ;;  %v269_v37 = vcombine.high %v265_v31, %v265_v31 }
  0x2f   :  { %1062 = vmatprep.subr.bf16.mxu0 %v1061_v10  ;;  %1067 = vmatprep.subr.bf16.mxu1 %v1061_v10  ;;  %v325_v34 = vrot.slane %v266_v32, %v275_v30  ;;  %v318_v38 = vcombine.high %v266_v32, %v266_v32 }
  0x30   :  { %v284_v35 = vcombine.high %v276_v33, %v276_v33  ;;  %v283_v42 = vrot.slane %v269_v37, %v275_v30  ;;  %v292_v43 = vrot.slane %v276_v33, %v275_v30 }
  0x31   :  { %v333_v36 = vcombine.high %v325_v34, %v325_v34  ;;  %v341_v44 = vrot.slane %v325_v34, %v275_v30  ;;  %v332_v45 = vrot.slane %v318_v38, %v275_v30 }
  0x32   :  { %1064 = vmatpush3.bf16.msra.mxu0 %v1061_v10  ;;  %1070 = vmatpush3.bf16.msra.mxu1 %v1061_v10  ;;  %v306_v39 = vrot.slane %v284_v35, %v275_v30  ;;  %v285_v50 = vcombine.high %v283_v42, %v283_v42  ;;  %v370_v51 = vrot.slane %v292_v43, %v1332_v40 }
  0x33   :  { %v355_v41 = vrot.slane %v333_v36, %v275_v30  ;;  %v402_v52 = vrot.slane %v341_v44, %v1332_v40  ;;  %v363_v53 = vcombine.high %v341_v44, %v341_v44  ;;  %v334_v54 = vcombine.high %v332_v45, %v332_v45 }
  0x34   :  { %v316_v46 = vcombine.high %v306_v39, %v306_v39  ;;  %v374_v47 = vrot.slane %v306_v39, %v1332_v40  ;;  %v314_v55 = vcombine.high %v292_v43, %v292_v43  ;;  %v1340_v0 = vrot.slane %v285_v50, %v275_v30 }
  0x35   :  { %1030 = vmatmul.mubr.msk.f32.vlgmr.msra.gmra.mrb[0].mxu0 %vm71_vm0, %v1265_v11  ;;  %1042 = vmatmul.mubr.msk.f32.vlgmr.msra.gmra.mrb[0].mxu1 %vm71_vm0, %v1267_v12  ;;  %v406_v48 = vrot.slane %v355_v41, %v1332_v40  ;;  %v365_v49 = vcombine.high %v355_v41, %v355_v41  ;;  %v410_v3 = vrot.slane %v363_v53, %v1332_v40 }
  0x36   :  { %1032 = vmatprep.mubr.msk.f32.mxu0 %vm71_vm0, %v1269_v13  ;;  %1044 = vmatprep.mubr.msk.f32.mxu1 %vm71_vm0, %v1271_v14  ;;  %v382_v58 = vrot.slane %v316_v46, %v1332_v40  ;;  %v362_v4 = vrot.slane %v334_v54, %v275_v30  ;;  %v378_v5 = vrot.slane %v314_v55, %v1332_v40 }
  0x37   :  { %v414_v63 = vrot.slane %v365_v49, %v1332_v40  ;;  %v390_v31 = vrot.slane %v1340_v0, %v1332_v40  ;;  %v348_v34 = vrot.slane %v332_v45, %v275_v30  ;;  %v299_v36 = vrot.slane %v283_v42, %v275_v30  ;;  %v1352_v45 = vld [vmem:[%s1498_s4] ss:$0 sm:$0xff] }
  0x38   :  { %v422_v33 = vrot.slane %v362_v4, %v1332_v40  ;;  %v366_v53 = vcombine.high %v362_v4, %v362_v4 }
  0x39   :  { %1033 = vmatmul.mubr.msk.f32.gmra.mrb[2].mxu0 %vm71_vm0, %v1279_v15  ;;  %1045 = vmatmul.mubr.msk.f32.gmra.mrb[2].mxu1 %vm71_vm0, %v1283_v16  ;;  %v315_v44 = vcombine.high %v299_v36, %v299_v36  ;;  %v386_v49 = vrot.slane %v299_v36, %v1332_v40 }
  0x3a   :  { %1035 = vmatprep.mubr.msk.f32.mxu0 %vm71_vm0, %v1285_v17  ;;  %1047 = vmatprep.mubr.msk.f32.mxu1 %vm71_vm0, %v1287_v18 }
  0x3d   :  { %1036 = vmatmul.mubr.msk.f32.gmra.mrb[4].mxu0 %vm71_vm0, %v1295_v19  ;;  %1048 = vmatmul.mubr.msk.f32.gmra.mrb[4].mxu1 %vm71_vm0, %v1299_v20 }
  0x3e   :  { %1038 = vmatprep.mubr.msk.f32.mxu0 %vm71_vm0, %v1301_v21  ;;  %1050 = vmatprep.mubr.msk.f32.mxu1 %vm71_vm0, %v1303_v22 }
  0x41   :  { %1039 = vmatmul.mubr.msk.f32.gmra.mrb[6].mxu0 %vm71_vm0, %v1311_v23  ;;  %1051 = vmatmul.mubr.msk.f32.gmra.mrb[6].mxu1 %vm71_vm0, %v1315_v24 }
 0x108   :  { %v1031_v56 = vpop.f32.mrb[0].mxu0  ;;  %v1043_v57 = vpop.f32.mrb[0].mxu1 }
 0x109   :  { %v448_v59 = vadd.f32 %v1031_v56, %v374_v47  ;;  %v456_v60 = vadd.f32 %v1043_v57, %v406_v48  ;;  %v186_v61 = vpop.f32.mrb[1].mxu0  ;;  %v226_v62 = vpop.f32.mrb[1].mxu1  ;;  %v418_v47 = vrot.slane %v348_v34, %v1332_v40  ;;  %v364_v48 = vcombine.high %v348_v34, %v348_v34 }
 0x10a   :  { %v447_v1 = vadd.f32 %v370_v51, %v186_v61  ;;  %v455_v2 = vadd.f32 %v402_v52, %v226_v62  ;;  %v394_v52 = vrot.slane %v315_v44, %v1332_v40  ;;  %v317_v62 = vcombine.high %v1340_v0, %v1340_v0 }
 0x10b   :  { %1079 = vtanh.f32 %v448_v59 }
 0x10c   :  { %1081 = vtanh.f32 %v456_v60  ;;  %v1034_v6 = vpop.f32.mrb[2].mxu0  ;;  %v1046_v7 = vpop.f32.mrb[2].mxu1 }
 0x10d   :  { %1083 = vtanh.f32 %v447_v1  ;;  %v450_v10 = vadd.f32 %v1034_v6, %v382_v58  ;;  %v196_v25 = vpop.f32.mrb[3].mxu0  ;;  %v458_v26 = vadd.f32 %v1046_v7, %v414_v63  ;;  %v236_v28 = vpop.f32.mrb[3].mxu1  ;;  %v426_v58 = vrot.slane %v364_v48, %v1332_v40 }
 0x10e   :  { %1085 = vtanh.f32 %v455_v2  ;;  %v457_v32 = vadd.f32 %v410_v3, %v236_v28  ;;  %v449_v35 = vadd.f32 %v378_v5, %v196_v25  ;;  %v430_v7 = vrot.slane %v366_v53, %v1332_v40 }
 0x10f   :  { %1087 = vtanh.f32 %v450_v10  ;;  %v398_v28 = vrot.slane %v317_v62, %v1332_v40 }
 0x110   :  { %v1037_v37 = vpop.f32.mrb[4].mxu0  ;;  %v1049_v38 = vpop.f32.mrb[4].mxu1  ;;  %1089 = vtanh.f32 %v458_v26 }
 0x111   :  { %v452_v39 = vadd.f32 %v1037_v37, %v390_v31  ;;  %v206_v41 = vpop.f32.mrb[5].mxu0  ;;  %v246_v43 = vpop.f32.mrb[5].mxu1  ;;  %1091 = vtanh.f32 %v457_v32  ;;  %v460_v46 = vadd.f32 %v1049_v38, %v422_v33 }
 0x112   :  { %1093 = vtanh.f32 %v449_v35  ;;  %v459_v57 = vadd.f32 %v418_v47, %v246_v43  ;;  %v451_v60 = vadd.f32 %v386_v49, %v206_v41 }
 0x113   :  { %1095 = vtanh.f32 %v452_v39 }
 0x114   :  { %v1040_v30 = vpop.f32.mrb[6].mxu0  ;;  %v1052_v42 = vpop.f32.mrb[6].mxu1  ;;  %1097 = vtanh.f32 %v460_v46 }
 0x115   :  { %v1080_v50 = vpop.eup %1079  ;;  %v216_v51 = vpop.f32.mrb[7].mxu0  ;;  %1099 = vtanh.f32 %v459_v57  ;;  %v462_v35 = vadd.f32 %v1052_v42, %v430_v7  ;;  %v454_v38 = vadd.f32 %v1040_v30, %v398_v28 }
 0x116   :  { %v256_v54 = vpop.f32.mrb[7].mxu1  ;;  %v1082_v55 = vpop.eup %1081  ;;  %v487_v56 = vmul.f32 %v1080_v50, %v1352_v45  ;;  %v453_v6 = vadd.f32 %v394_v52, %v216_v51  ;;  %1101 = vtanh.f32 %v451_v60 }
 0x117   :  { %v1084_v59 = vpop.eup %1083  ;;  %v495_v61 = vmul.f32 %v1082_v55, %v1352_v45  ;;  %v461_v10 = vadd.f32 %v426_v58, %v256_v54 }
 0x118   :  { %v1086_v63 = vpop.eup %1085  ;;  %v506_v1 = vsel %vm502_vm1, %v487_v56, 0.0  ;;  %v486_v2 = vmul.f32 %v1084_v59, %v1352_v45  ;;  %1103 = vtanh.f32 %v453_v6 }
 0x119   :  { %v1088_v3 = vpop.eup %1087  ;;  %v530_v4 = vsel %vm502_vm1, %v495_v61, 0.0  ;;  %507 = vadd.xlane.f32.xlu0 %v506_v1  ;;  %v494_v5 = vmul.f32 %v1086_v63, %v1352_v45  ;;  %1105 = vtanh.f32 %v461_v10 }
 0x11a   :  { %531 = vadd.xlane.f32.xlu1 %v530_v4  ;;  %v489_v25 = vmul.f32 %v1088_v3, %v1352_v45  ;;  %v1090_v0 = vpop.eup %1089  ;;  %v503_v32 = vsel %vm502_vm1, %v486_v2, 0.0  ;;  %1107 = vtanh.f32 %v462_v35 }
 0x11b   :  { %v527_v26 = vsel %vm502_vm1, %v494_v5, 0.0  ;;  %v1092_v31 = vpop.eup %1091  ;;  %v497_v33 = vmul.f32 %v1090_v0, %v1352_v45  ;;  %1109 = vtanh.f32 %v454_v38 }
 0x11c   :  { %v1094_v34 = vpop.eup %1093  ;;  %v512_v36 = vsel %vm502_vm1, %v489_v25, 0.0  ;;  %v496_v41 = vmul.f32 %v1092_v31, %v1352_v45 }
 0x11d   :  { %504 = vadd.xlane.f32.xlu0 %v503_v32  ;;  %v1096_v37 = vpop.eup %1095  ;;  %v536_v39 = vsel %vm502_vm1, %v497_v33, 0.0  ;;  %v488_v44 = vmul.f32 %v1094_v34, %v1352_v45 }
 0x11e   :  { %528 = vadd.xlane.f32.xlu1 %v527_v26  ;;  %v1098_v43 = vpop.eup %1097  ;;  %v491_v46 = vmul.f32 %v1096_v37, %v1352_v45  ;;  %v533_v47 = vsel %vm502_vm1, %v496_v41, 0.0  ;;  %v572_v26 = vand.u32 127, %v273_v27 }
 0x11f   :  { %v499_v48 = vmul.f32 %v1098_v43, %v1352_v45  ;;  %v1100_v49 = vpop.eup %1099  ;;  %v509_v30 = vsel %vm502_vm1, %v488_v44, 0.0 }
 0x120   :  { %v1102_v42 = vpop.eup %1101  ;;  %v518_v50 = vsel %vm502_vm1, %v491_v46, 0.0  ;;  %v498_v53 = vmul.f32 %v1100_v49, %v1352_v45 }
 0x121   :  { %513 = vadd.xlane.f32.xlu0 %v512_v36  ;;  %v542_v52 = vsel %vm502_vm1, %v499_v48, 0.0  ;;  %v490_v55 = vmul.f32 %v1102_v42, %v1352_v45 }
 0x122   :  { %537 = vadd.xlane.f32.xlu1 %v536_v39  ;;  %v1104_v51 = vpop.eup %1103  ;;  %v539_v57 = vsel %vm502_vm1, %v498_v53, 0.0 }
 0x123   :  { %v1106_v54 = vpop.eup %1105  ;;  %v492_v56 = vmul.f32 %v1104_v51, %v1352_v45  ;;  %v515_v60 = vsel %vm502_vm1, %v490_v55, 0.0 }
 0x124   :  { %v500_v58 = vmul.f32 %v1106_v54, %v1352_v45  ;;  %v1108_v59 = vpop.eup %1107 }
 0x125   :  { %510 = vadd.xlane.f32.xlu0 %v509_v30  ;;  %v1110_v61 = vpop.eup %1109  ;;  %v521_v62 = vsel %vm502_vm1, %v492_v56, 0.0  ;;  %v501_v1 = vmul.f32 %v1108_v59, %v1352_v45 }
 0x126   :  { %534 = vadd.xlane.f32.xlu1 %v533_v47  ;;  %v545_v63 = vsel %vm502_vm1, %v500_v58, 0.0  ;;  %v493_v2 = vmul.f32 %v1110_v61, %v1352_v45  ;;  %v575_v45 = vsub.s32 %v572_v26, %v1322_v29  ;;  %v551_v58 = vld [vmem:[%s1496_s2] sm:$0xff] }
 0x127   :  { %v548_v3 = vsel %vm502_vm1, %v501_v1, 0.0  ;;  %vm553_vm10 = vcmp.ne.s32.totalorder %v551_v58, 0  ;;  %v722_v58 = vsub.s32 5, %v1322_v29 }
 0x128   :  { %v524_v4 = vsel %vm502_vm1, %v493_v2, 0.0 }
 0x129   :  { %519 = vadd.xlane.f32.xlu0 %v518_v50 }
 0x12a   :  { %543 = vadd.xlane.f32.xlu1 %v542_v52 }
 0x12d   :  { %516 = vadd.xlane.f32.xlu0 %v515_v60 }
 0x12e   :  { %540 = vadd.xlane.f32.xlu1 %v539_v57  ;;  %v552_v57 = vld [vmem:[%s1496_s2 + $0x8] sm:$0xff]  ;;  %s1196_s2 = smov [#allocation7]  }
 0x12f   :  { %vm554_vm9 = vcmp.ne.s32.totalorder %v552_v57, 0  ;;  %s965_s25 = sshll.u32 %s1196_s2, 4  ;;  %s966_s25 = int_to_ptr.vmem [resolvable:$true] %s965_s25 }
 0x130   :  { %s1163_s26 = scalar_lea.vmem %s966_s25, 256  ;;  %p1168_p3 = scmp.lt.s32.totalorder %s966_s25, %s966_s25 }
 0x131   :  { %522 = vadd.xlane.f32.xlu0 %v521_v62  ;;  %p1164_p2 = scmp.ne.s32.totalorder %s966_s25, %s1163_s26  ;;  %p1169_p4 = scmp.lt.s32.totalorder %s1163_s26, %s1163_s26 }
 0x132   :  { %546 = vadd.xlane.f32.xlu1 %v545_v63 }
 0x133   :  { %p1170_p5 = por %p1169_p4, %p1168_p3 }
 0x135   :  { %525 = vadd.xlane.f32.xlu0 %v524_v4  ;;  %p1171_p6 = pnand %p1170_p5, %p1164_p2 }
 0x136   :  { %549 = vadd.xlane.f32.xlu1 %v548_v3 }
 0x1a6   :  { %v508_v5 = vpop.xlane.xlu0 %507 }
 0x1a7   :  { %v532_v6 = vpop.xlane.xlu1 %531  ;;  %v580_v38 = vrot.slane %v508_v5, %v575_v45 }
 0x1a8   :  { %v612_v35 = vrot.slane %v532_v6, %v575_v45 }
 0x1aa   :  { %v505_v7 = vpop.xlane.xlu0 %504 }
 0x1ab   :  { %v529_v10 = vpop.xlane.xlu1 %528  ;;  %v576_v33 = vrot.slane %v505_v7, %v575_v45 }
 0x1ac   :  { %v608_v36 = vrot.slane %v529_v10, %v575_v45 }
 0x1ad   :  { %v638_v43 = vsel %vm637_vm2, %v580_v38, %v576_v33 }
 0x1ae   :  { %v514_v25 = vpop.xlane.xlu0 %513  ;;  %v651_v27 = vsel %vm637_vm2, %v612_v35, %v608_v36 }
 0x1af   :  { %v538_v0 = vpop.xlane.xlu1 %537  ;;  %v588_v49 = vrot.slane %v514_v25, %v575_v45 }
 0x1b0   :  { %v620_v46 = vrot.slane %v538_v0, %v575_v45 }
 0x1b2   :  { %v511_v28 = vpop.xlane.xlu0 %510 }
 0x1b3   :  { %v535_v31 = vpop.xlane.xlu1 %534  ;;  %v584_v37 = vrot.slane %v511_v28, %v575_v45 }
 0x1b4   :  { %v616_v39 = vrot.slane %v535_v31, %v575_v45 }
 0x1b5   :  { %v640_v47 = vsel %vm639_vm3, %v584_v37, %v638_v43 }
 0x1b6   :  { %v520_v32 = vpop.xlane.xlu0 %519  ;;  %v652_v30 = vsel %vm639_vm3, %v616_v39, %v651_v27  ;;  %v642_v51 = vsel %vm641_vm4, %v588_v49, %v640_v47 }
 0x1b7   :  { %v544_v34 = vpop.xlane.xlu1 %543  ;;  %v653_v54 = vsel %vm641_vm4, %v620_v46, %v652_v30  ;;  %v596_v59 = vrot.slane %v520_v32, %v575_v45 }
 0x1b8   :  { %v628_v53 = vrot.slane %v544_v34, %v575_v45 }
 0x1ba   :  { %v517_v41 = vpop.xlane.xlu0 %516 }
 0x1bb   :  { %v541_v44 = vpop.xlane.xlu1 %540  ;;  %v592_v48 = vrot.slane %v517_v41, %v575_v45 }
 0x1bc   :  { %v624_v42 = vrot.slane %v541_v44, %v575_v45  ;;  %v694_v44 = vsub.s32 1, %v1322_v29 }
 0x1bd   :  { %v644_v55 = vsel %vm643_vm5, %v592_v48, %v642_v51 }
 0x1be   :  { %v523_v50 = vpop.xlane.xlu0 %522  ;;  %v654_v60 = vsel %vm643_vm5, %v624_v42, %v653_v54  ;;  %v646_v2 = vsel %vm645_vm6, %v596_v59, %v644_v55  ;;  %v701_v42 = vsub.s32 2, %v1322_v29  ;;  %v715_v55 = vsub.s32 4, %v1322_v29 }
 0x1bf   :  { %v547_v52 = vpop.xlane.xlu1 %546  ;;  %v600_v56 = vrot.slane %v523_v50, %v575_v45  ;;  %v655_v4 = vsel %vm645_vm6, %v628_v53, %v654_v60 }
 0x1c0   :  { %v632_v61 = vrot.slane %v547_v52, %v575_v45  ;;  %v708_v52 = vsub.s32 3, %v1322_v29 }
 0x1c1   :  { %v648_v5 = vsel %vm647_vm7, %v600_v56, %v646_v2 }
 0x1c2   :  { %v526_v62 = vpop.xlane.xlu0 %525  ;;  %v656_v6 = vsel %vm647_vm7, %v632_v61, %v655_v4 }
 0x1c3   :  { %v550_v63 = vpop.xlane.xlu1 %549  ;;  %v604_v1 = vrot.slane %v526_v62, %v575_v45 }
 0x1c4   :  { %v636_v3 = vrot.slane %v550_v63, %v575_v45  ;;  %v736_v63 = vsub.s32 7, %v1322_v29 }
 0x1c5   :  { %v650_v7 = vsel %vm649_vm8, %v604_v1, %v648_v5 }
 0x1c6   :  { %v657_v10 = vsel %vm649_vm8, %v636_v3, %v656_v6  ;;  %v660_v25 = vsel %vm553_vm10, -inf, %v650_v7 }
 0x1c7   :  { %v661_v0 = vsel %vm554_vm9, -inf, %v657_v10  ;;  %v663_v26 = vsel %vm662_vm11, %v660_v25, -inf }
 0x1c8   :  { %v666_v28 = vsel %vm662_vm11, %v661_v0, -inf  ;;  %664 = vmax.xlane.f32.xlu0 %v663_v26 }
 0x1c9   :  { %667 = vmax.xlane.f32.xlu1 %v666_v28 }
 0x255   :  { %v665_v31 = vpop.xlane.xlu0 %664 }
 0x256   :  { %v668_v45 = vpop.xlane.xlu1 %667  ;;  %v669_v32 = vsub.f32 %v660_v25, %v665_v31 }
 0x257   :  { %v670_v33 = vsub.f32 %v661_v0, %v668_v45 }
 0x258   :  { %v671_v34 = vmul.f32 1.442695, %v669_v32 }
 0x259   :  { %v673_v35 = vmul.f32 1.442695, %v670_v33 }
 0x25a   :  { %1111 = vpow2.f32 %v671_v34 }
 0x25b   :  { %1113 = vpow2.f32 %v673_v35 }
 0x264   :  { %v1112_v36 = vpop.eup %1111 }
 0x265   :  { %v1114_v37 = vpop.eup %1113  ;;  %v675_v38 = vsel %vm662_vm11, %v1112_v36, 0.0 }
 0x266   :  { %v678_v39 = vsel %vm662_vm11, %v1114_v37, 0.0  ;;  %676 = vadd.xlane.f32.xlu0 %v675_v38 }
 0x267   :  { %679 = vadd.xlane.f32.xlu1 %v678_v39 }
 0x2f3   :  { %v677_v41 = vpop.xlane.xlu0 %676 }
 0x2f4   :  { %v680_v43 = vpop.xlane.xlu1 %679  ;;  %1115 = vrcp.f32 %v677_v41 }
 0x2f5   :  { %1117 = vrcp.f32 %v680_v43 }
 0x2fe   :  { %v1116_v27 = vpop.eup %1115 }
 0x2ff   :  { %v1118_v46 = vpop.eup %1117  ;;  %v683_v47 = vmul.f32 %v1116_v27, %v1112_v36 }
 0x300   :  { %v684_v48 = vmul.f32 %v1118_v46, %v1114_v37 }
 0x301   :  { %v695_v49 = vrot.slane %v683_v47, %v694_v44  ;;  %v688_v30 = vrot.slane %v683_v47, %v1332_v40  ;;  %v702_v51 = vrot.slane %v683_v47, %v701_v42  ;;  %v709_v54 = vrot.slane %v683_v47, %v708_v52 }
 0x302   :  { %v744_v50 = vrot.slane %v684_v48, %v1332_v40  ;;  %v751_v53 = vrot.slane %v684_v48, %v694_v44  ;;  %v758_v56 = vrot.slane %v684_v48, %v701_v42  ;;  %v716_v57 = vrot.slane %v683_v47, %v715_v55 }
 0x303   :  { %697 = vbcast.lane.b32.xlu1 %v695_v49, 256  ;;  %690 = vbcast.lane.b32.xlu0 %v688_v30, 256  ;;  %v765_v59 = vrot.slane %v684_v48, %v708_v52  ;;  %v723_v60 = vrot.slane %v683_v47, %v722_v58  ;;  %v729_v40 = vsub.s32 6, %v1322_v29  ;;  %v772_v61 = vrot.slane %v684_v48, %v715_v55 }
 0x304   :  { %v779_v1 = vrot.slane %v684_v48, %v722_v58  ;;  %v737_v2 = vrot.slane %v683_v47, %v736_v63  ;;  %v793_v4 = vrot.slane %v684_v48, %v736_v63 }
 0x305   :  { %v730_v62 = vrot.slane %v683_v47, %v729_v40  ;;  %v786_v3 = vrot.slane %v684_v48, %v729_v40 }
 0x307   :  { %746 = vbcast.lane.b32.xlu1 %v744_v50, 256  ;;  %704 = vbcast.lane.b32.xlu0 %v702_v51, 256 }
 0x30b   :  { %753 = vbcast.lane.b32.xlu1 %v751_v53, 256  ;;  %711 = vbcast.lane.b32.xlu0 %v709_v54, 256 }
 0x30f   :  { %760 = vbcast.lane.b32.xlu1 %v758_v56, 256  ;;  %718 = vbcast.lane.b32.xlu0 %v716_v57, 256 }
 0x313   :  { %767 = vbcast.lane.b32.xlu1 %v765_v59, 256  ;;  %725 = vbcast.lane.b32.xlu0 %v723_v60, 256 }
 0x317   :  { %774 = vbcast.lane.b32.xlu1 %v772_v61, 256  ;;  %732 = vbcast.lane.b32.xlu0 %v730_v62, 256 }
 0x31b   :  { %781 = vbcast.lane.b32.xlu1 %v779_v1, 256  ;;  %739 = vbcast.lane.b32.xlu0 %v737_v2, 256 }
 0x31f   :  { %788 = vbcast.lane.b32.xlu1 %v786_v3, 256 }
 0x323   :  { %795 = vbcast.lane.b32.xlu1 %v793_v4, 256 }
 0x375   :  { %v698_v5 = vpop.permute.xlu1 %697  ;;  %v691_v6 = vpop.permute.xlu0 %690 }
 0x376   :  { %v798_v7 = vmul.f32 %v698_v5, %v1265_v11  ;;  %v797_v10 = vmul.f32 %v691_v6, %v1257_v8 }
 0x378   :  { %v821_v25 = vsel %vm813_vm12, %v798_v7, 0.0  ;;  %v814_v29 = vsel %vm813_vm12, %v797_v10, 0.0 }
 0x379   :  { %v822_v0 = vrot.slane %v821_v25, 4  ;;  %v815_v26 = vrot.slane %v814_v29, 4  ;;  %v747_v28 = vpop.permute.xlu1 %746  ;;  %v705_v31 = vpop.permute.xlu0 %704 }
 0x37a   :  { %v805_v45 = vmul.f32 %v747_v28, %v1259_v9  ;;  %v799_v32 = vmul.f32 %v705_v31, %v1269_v13 }
 0x37b   :  { %v823_v33 = vadd.f32 %v822_v0, %v821_v25  ;;  %v816_v34 = vadd.f32 %v815_v26, %v814_v29 }
 0x37c   :  { %v870_v35 = vsel %vm813_vm12, %v805_v45, 0.0  ;;  %v828_v11 = vsel %vm813_vm12, %v799_v32, 0.0 }
 0x37d   :  { %v824_v36 = vrot.slane %v823_v33, 2  ;;  %v754_v8 = vpop.permute.xlu1 %753  ;;  %v712_v37 = vpop.permute.xlu0 %711  ;;  %v817_v38 = vrot.slane %v816_v34, 2  ;;  %v829_v39 = vrot.slane %v828_v11, 4  ;;  %v871_v44 = vrot.slane %v870_v35, 4 }
 0x37e   :  { %v806_v41 = vmul.f32 %v754_v8, %v1267_v12  ;;  %v800_v43 = vmul.f32 %v712_v37, %v1279_v15 }
 0x37f   :  { %v825_v27 = vadd.f32 %v824_v36, %v823_v33  ;;  %v818_v48 = vadd.f32 %v817_v38, %v816_v34  ;;  %v830_v49 = vadd.f32 %v829_v39, %v828_v11  ;;  %v872_v50 = vadd.f32 %v871_v44, %v870_v35 }
 0x380   :  { %v877_v9 = vsel %vm813_vm12, %v806_v41, 0.0  ;;  %v835_v13 = vsel %vm813_vm12, %v800_v43, 0.0 }
 0x381   :  { %v761_v46 = vpop.permute.xlu1 %760  ;;  %v719_v47 = vpop.permute.xlu0 %718  ;;  %v878_v51 = vrot.slane %v877_v9, 4  ;;  %v836_v52 = vrot.slane %v835_v13, 4  ;;  %v826_v15 = vrot.slane %v825_v27, 1  ;;  %v819_v56 = vrot.slane %v818_v48, 1 }
 0x382   :  { %v807_v30 = vmul.f32 %v761_v46, %v1271_v14  ;;  %v801_v42 = vmul.f32 %v719_v47, %v1285_v17  ;;  %v831_v57 = vrot.slane %v830_v49, 2  ;;  %v873_v60 = vrot.slane %v872_v50, 2 }
 0x383   :  { %v879_v40 = vadd.f32 %v878_v51, %v877_v9  ;;  %v837_v17 = vadd.f32 %v836_v52, %v835_v13  ;;  %v827_v5 = vadd.f32 %v826_v15, %v825_v27  ;;  %v820_v6 = vadd.f32 %v819_v56, %v818_v48 }
 0x384   :  { %v842_v12 = vsel %vm813_vm12, %v801_v42, 0.0  ;;  %v884_v53 = vsel %vm813_vm12, %v807_v30, 0.0  ;;  %v832_v7 = vadd.f32 %v831_v57, %v830_v49  ;;  %v1447_v25 = vadd.f32 %v873_v60, %v872_v50 }
 0x385   :  { %v768_v54 = vpop.permute.xlu1 %767  ;;  %v726_v55 = vpop.permute.xlu0 %725  ;;  %v843_v58 = vrot.slane %v842_v12, 4  ;;  %v885_v61 = vrot.slane %v884_v53, 4  ;;  %v838_v0 = vrot.slane %v837_v17, 2  ;;  %v942_v11 = vsel %vm637_vm2, %v827_v5, %v820_v6 }
 0x386   :  { %v808_v59 = vmul.f32 %v768_v54, %v1283_v16  ;;  %v802_v14 = vmul.f32 %v726_v55, %v1295_v19  ;;  %v880_v16 = vrot.slane %v879_v40, 2  ;;  %v833_v36 = vrot.slane %v832_v7, 1 }
 0x387   :  { %v844_v63 = vadd.f32 %v843_v58, %v842_v12  ;;  %v886_v26 = vadd.f32 %v885_v61, %v884_v53  ;;  %v875_v37 = vrot.slane %v1447_v25, 1  ;;  %v839_v39 = vadd.f32 %v838_v0, %v837_v17 }
 0x388   :  { %v891_v62 = vsel %vm813_vm12, %v808_v59, 0.0  ;;  %v849_v2 = vsel %vm813_vm12, %v802_v14, 0.0  ;;  %v834_v48 = vadd.f32 %v833_v36, %v832_v7 }
 0x389   :  { %v892_v1 = vrot.slane %v891_v62, 4  ;;  %v775_v3 = vpop.permute.xlu1 %774  ;;  %v733_v4 = vpop.permute.xlu0 %732  ;;  %v850_v10 = vrot.slane %v849_v2, 4  ;;  %v845_v31 = vrot.slane %v844_v63, 2  ;;  %v887_v41 = vrot.slane %v886_v26, 2 }
 0x38a   :  { %v809_v29 = vmul.f32 %v775_v3, %v1287_v18  ;;  %v803_v19 = vmul.f32 %v733_v4, %v1301_v21  ;;  %v881_v18 = vadd.f32 %v880_v16, %v879_v40  ;;  %v840_v15 = vrot.slane %v839_v39, 1 }
 0x38b   :  { %v851_v28 = vadd.f32 %v850_v10, %v849_v2  ;;  %v893_v45 = vadd.f32 %v892_v1, %v891_v62  ;;  %v846_v9 = vadd.f32 %v845_v31, %v844_v63  ;;  %v888_v53 = vadd.f32 %v887_v41, %v886_v26 }
 0x38c   :  { %v898_v32 = vsel %vm813_vm12, %v809_v29, 0.0  ;;  %v856_v33 = vsel %vm813_vm12, %v803_v19, 0.0  ;;  %v882_v50 = vrot.slane %v881_v18, 1  ;;  %v943_v1 = vsel %vm639_vm3, %v834_v48, %v942_v11 }
 0x38d   :  { %v782_v34 = vpop.permute.xlu1 %781  ;;  %v740_v35 = vpop.permute.xlu0 %739  ;;  %v852_v8 = vrot.slane %v851_v28, 2  ;;  %v899_v38 = vrot.slane %v898_v32, 4  ;;  %v857_v21 = vrot.slane %v856_v33, 4  ;;  %v894_v27 = vrot.slane %v893_v45, 2 }
 0x38e   :  { %v810_v43 = vmul.f32 %v782_v34, %v1299_v20  ;;  %v804_v44 = vmul.f32 %v740_v35, %v1311_v23  ;;  %v847_v54 = vrot.slane %v846_v9, 1  ;;  %v841_v2 = vadd.f32 %v840_v15, %v839_v39 }
 0x38f   :  { %v900_v13 = vadd.f32 %v899_v38, %v898_v32  ;;  %v858_v46 = vadd.f32 %v857_v21, %v856_v33  ;;  %v853_v49 = vadd.f32 %v852_v8, %v851_v28  ;;  %v895_v55 = vadd.f32 %v894_v27, %v893_v45 }
 0x390   :  { %v905_v30 = vsel %vm813_vm12, %v810_v43, 0.0  ;;  %v863_v42 = vsel %vm813_vm12, %v804_v44, 0.0  ;;  %v889_v4 = vrot.slane %v888_v53, 1  ;;  %v848_v5 = vadd.f32 %v847_v54, %v846_v9 }
 0x391   :  { %v789_v47 = vpop.permute.xlu1 %788  ;;  %v901_v51 = vrot.slane %v900_v13, 2  ;;  %v859_v52 = vrot.slane %v858_v46, 2  ;;  %v906_v12 = vrot.slane %v905_v30, 4  ;;  %v864_v20 = vrot.slane %v863_v42, 4 }
 0x392   :  { %v811_v23 = vmul.f32 %v789_v47, %v1303_v22  ;;  %v854_v59 = vrot.slane %v853_v49, 1  ;;  %v896_v10 = vrot.slane %v895_v55, 1  ;;  %v883_v0 = vadd.f32 %v882_v50, %v881_v18 }
 0x393   :  { %v860_v56 = vadd.f32 %v859_v52, %v858_v46  ;;  %v907_v57 = vadd.f32 %v906_v12, %v905_v30  ;;  %v865_v60 = vadd.f32 %v864_v20, %v863_v42  ;;  %v902_v17 = vadd.f32 %v901_v51, %v900_v13 }
 0x394   :  { %v912_v40 = vsel %vm813_vm12, %v811_v23, 0.0  ;;  %v855_v16 = vadd.f32 %v854_v59, %v853_v49  ;;  %v944_v31 = vsel %vm641_vm4, %v841_v2, %v943_v1  ;;  %v876_v34 = vadd.f32 %v875_v37, %v1447_v25 }
 0x395   :  { %v796_v58 = vpop.permute.xlu1 %795  ;;  %v861_v61 = vrot.slane %v860_v56, 1  ;;  %v908_v62 = vrot.slane %v907_v57, 2  ;;  %v913_v63 = vrot.slane %v912_v40, 4  ;;  %v866_v3 = vrot.slane %v865_v60, 2 }
 0x396   :  { %v812_v14 = vmul.f32 %v796_v58, %v1315_v24  ;;  %v903_v24 = vrot.slane %v902_v17, 1  ;;  %v890_v35 = vadd.f32 %v889_v4, %v888_v53  ;;  %v945_v11 = vsel %vm643_vm5, %v848_v5, %v944_v31 }
 0x397   :  { %v909_v6 = vadd.f32 %v908_v62, %v907_v57  ;;  %v914_v7 = vadd.f32 %v913_v63, %v912_v40  ;;  %v867_v29 = vadd.f32 %v866_v3, %v865_v60  ;;  %v862_v26 = vadd.f32 %v861_v61, %v860_v56 }
 0x398   :  { %v919_v22 = vsel %vm813_vm12, %v812_v14, 0.0  ;;  %v897_v8 = vadd.f32 %v896_v10, %v895_v55  ;;  %v946_v39 = vsel %vm645_vm6, %v855_v16, %v945_v11  ;;  %v904_v18 = vadd.f32 %v903_v24, %v902_v17 }
 0x399   :  { %v920_v19 = vrot.slane %v919_v22, 4  ;;  %v915_v28 = vrot.slane %v914_v7, 2  ;;  %v910_v45 = vrot.slane %v909_v6, 1  ;;  %v868_v32 = vrot.slane %v867_v29, 1 }
 0x39a   :  { %v947_v43 = vsel %vm647_vm7, %v862_v26, %v946_v39  ;;  %v949_v44 = vsel %vm637_vm2, %v883_v0, %v876_v34 }
 0x39b   :  { %v921_v33 = vadd.f32 %v920_v19, %v919_v22  ;;  %v916_v36 = vadd.f32 %v915_v28, %v914_v7  ;;  %v869_v38 = vadd.f32 %v868_v32, %v867_v29  ;;  %v911_v9 = vadd.f32 %v910_v45, %v909_v6 }
 0x39c   :  { %v950_v25 = vsel %vm639_vm3, %v890_v35, %v949_v44 }
 0x39d   :  { %v922_v21 = vrot.slane %v921_v33, 2  ;;  %v917_v41 = vrot.slane %v916_v36, 1  ;;  %v948_v13 = vsel %vm649_vm8, %v869_v38, %v947_v43  ;;  %v951_v46 = vsel %vm641_vm4, %v897_v8, %v950_v25 }
 0x39e   :  { %958 = vst.msk [vmem:[#allocation7] sm:$0xff] %vm813_vm12, %v948_v13  ;;  %v952_v48 = vsel %vm643_vm5, %v904_v18, %v951_v46 }
 0x39f   :  { %v923_v27 = vadd.f32 %v922_v21, %v921_v33  ;;  %v918_v37 = vadd.f32 %v917_v41, %v916_v36  ;;  %v953_v30 = vsel %vm645_vm6, %v911_v9, %v952_v48 }
 0x3a1   :  { %v924_v47 = vrot.slane %v923_v27, 1  ;;  %v954_v42 = vsel %vm647_vm7, %v918_v37, %v953_v30 }
 0x3a3   :  { %v925_v49 = vadd.f32 %v924_v47, %v923_v27 }
 0x3a5   :  { %v955_v50 = vsel %vm649_vm8, %v925_v49, %v954_v42 }
 0x3a6   :  { %959 = vst.msk [vmem:[#allocation7 + $0x8] sm:$0xff] %vm813_vm12, %v955_v50 }
 0x3a7   :  { %1174 = shalt.err (!%p1171_p6)
}
 0x3a8   :  { %s1175_s6 = scalar_lea.hbm %s1499_s5, 256 }
 0x3a9   :  { %p1176_p7 = scmp.ne.s32.totalorder %s1499_s5, %s1175_s6  ;;  %p1179_p8 = scmp.lt.u32.totalorder %s1175_s6, %s1499_s5 }
 0x3ab   :  { %p1181_p9 = pnand %p1179_p8, %p1176_p7 }
 0x3ad   :  { %1184 = shalt.err (!%p1181_p9)
}
 0x3ae   :  { %971 = dma.vmem_to_hbm [thread:$0]  %s966_s25, 256, %s1499_s5, [#allocation4], %s1192_s28, %s1192_s28, %s1193_s29  }
 0x3af   :  { %1189 = dma.done.wait [#allocation4], 256  }
 0x3b0   :  { %1190 = vsyncadd [#allocation4], 4294967040 }
 0x3b1   :  { %975 = vsyncpa [#allocation3], 1 }
 0x3b2   :  { %976 = vsyncpa [#allocation6], 1 }
 0x3b3   :  { %977 = vsyncpa [#allocation4], 1 }

</bundles_post_ra>
